<compile_context>
chip_gen: v5e
topology: v5e:2x2
jax: 0.10.0
libtpu: 0.0.40
codegen_flags: <defaults>
</compile_context>

<pallas_src>
import jax
import jax.numpy as jnp
from jax.experimental import pallas as pl
from jax.experimental.pallas import tpu as pltpu


# ---------------------------------------------------------------------------
# Pallas kernels
# ---------------------------------------------------------------------------
def _conv_pool_kernel(p_ref, w_ref, b_ref, o_ref):
    # p: (4, K, N) bf16 pooling-phase im2col patches, w: (OC, K) bf16, b: (OC, 1) f32.
    # out[oc, n] = relu(b[oc] + max_ph sum_k w[oc, k] * p[ph, k, n])
    #            = (maxpool2x2 ∘ relu ∘ conv)(x) in (channel, batch*spatial) layout.
    w = w_ref[...]                                       # hoist: reused by all 4 matmuls
    m = jnp.dot(w, p_ref[0], preferred_element_type=jnp.float32)
    for ph in range(1, 4):
        m = jnp.maximum(m, jnp.dot(w, p_ref[ph], preferred_element_type=jnp.float32))
    o_ref[...] = jnp.maximum(m + b_ref[...], 0.0).astype(o_ref.dtype)


def _fc3_kernel(a_ref, w1_ref, b1_ref, w2_ref, b2_ref, w3_ref, b3_ref, o_ref):
    # Fused fc1 -> fc2 -> fc3. a: (B, 400) bf16; w*: (K, N) bf16; b*: (1, N) f32.
    # MXU runs in bf16, accumulation / bias / ReLU in f32, final logits in f32.
    h = jnp.dot(a_ref[...], w1_ref[...], preferred_element_type=jnp.float32)
    h = jnp.maximum(h + b1_ref[...], 0.0).astype(jnp.bfloat16)
    h = jnp.dot(h, w2_ref[...], preferred_element_type=jnp.float32)
    h = jnp.maximum(h + b2_ref[...], 0.0).astype(jnp.bfloat16)
    h = jnp.dot(h, w3_ref[...], preferred_element_type=jnp.float32)
    o_ref[...] = h + b3_ref[...]


# ---------------------------------------------------------------------------
# Conv-as-matmul glue (pooling-phase im2col; XLA ops, tiny at B=2)
# ---------------------------------------------------------------------------
def _phase_patches(x_cm, kh, kw):
    """x_cm: (C, B, H, W) channel-major.

    Returns (patches, (B, PH, PW)) with patches of shape (4, C*kh*kw, B*PH*PW):
      patches[2*a + b, c*kh*kw + i*kw + j, batch*PH*PW + p*PW + q]
          = x_cm[c, batch, 2*p + a + i, 2*q + b + j]
    i.e. the conv im2col restricted to pooling phase (a, b); feature order (c, i, j)
    matches PyTorch Conv2d weight flattening. MaxPool2d(2,2) floors odd sizes.
    """
    C, B, H, W = x_cm.shape
    OH, OW = H - kh + 1, W - kw + 1
    PH, PW = OH // 2, OW // 2
    taps = jnp.stack(
        [x_cm[:, :, i:i + OH, j:j + OW] for i in range(kh) for j in range(kw)],
        axis=0)                                              # (kh*kw, C, B, OH, OW)
    feats = jnp.transpose(taps, (1, 0, 2, 3, 4)).reshape(C * kh * kw, B, OH, OW)
    phases = jnp.stack(
        [feats[:, :, a:a + 2 * PH:2, b:b + 2 * PW:2] for a in (0, 1) for b in (0, 1)],
        axis=0)                                              # (4, K, B, PH, PW)
    return phases.reshape(4, C * kh * kw, B * PH * PW), (B, PH, PW)


def conv_relu_pool(x_cm, w_flat, b_col, kh=5, kw=5):
    """Fused Conv2d(stride 1, no pad) + bias + ReLU + MaxPool2d(2, 2).

    x_cm: (C, B, H, W) channel-major; w_flat: (OC, C*kh*kw) bf16 (PyTorch flatten order);
    b_col: (OC, 1) f32. Returns (OC, B, PH, PW) bf16, channel-major (no transpose needed
    to feed the next conv stage).
    """
    OC = w_flat.shape[0]
    patches, (B, PH, PW) = _phase_patches(x_cm.astype(jnp.bfloat16), kh, kw)
    out = pl.pallas_call(
        _conv_pool_kernel,
        out_shape=jax.ShapeDtypeStruct((OC, B * PH * PW), jnp.bfloat16),
        in_specs=[pl.BlockSpec(memory_space=pltpu.MemorySpace.VMEM)] * 3,
        out_specs=pl.BlockSpec(memory_space=pltpu.MemorySpace.VMEM),
    )(patches, w_flat, b_col)
    return out.reshape(OC, B, PH, PW)


def fc_fused(a, kp):
    """a: (B, 400). Returns logits (B, 10) f32 from the fused fc1->fc2->fc3 kernel."""
    B = a.shape[0]
    return pl.pallas_call(
        _fc3_kernel,
        out_shape=jax.ShapeDtypeStruct((B, kp["fc3_w"].shape[1]), jnp.float32),
        in_specs=[pl.BlockSpec(memory_space=pltpu.MemorySpace.VMEM)] * 7,
        out_specs=pl.BlockSpec(memory_space=pltpu.MemorySpace.VMEM),
    )(a.astype(jnp.bfloat16), kp["fc1_w"], kp["fc1_b"], kp["fc2_w"], kp["fc2_b"],
      kp["fc3_w"], kp["fc3_b"])


# ---------------------------------------------------------------------------
# Parameters (deterministic, PyTorch default-init-style uniform bounds)
# ---------------------------------------------------------------------------
def init_params(key):
    ks = jax.random.split(key, 10)

    def u(k, shape, fan_in):
        bound = 1.0 / (fan_in ** 0.5)
        return jax.random.uniform(k, shape, jnp.float32, -bound, bound)

    return {
        "conv1_w": u(ks[0], (6, 3, 5, 5), 3 * 5 * 5),
        "conv1_b": u(ks[1], (6,), 3 * 5 * 5),
        "conv2_w": u(ks[2], (16, 6, 5, 5), 6 * 5 * 5),
        "conv2_b": u(ks[3], (16,), 6 * 5 * 5),
        "fc1_w": u(ks[4], (120, 16 * 5 * 5), 16 * 5 * 5),
        "fc1_b": u(ks[5], (120,), 16 * 5 * 5),
        "fc2_w": u(ks[6], (84, 120), 120),
        "fc2_b": u(ks[7], (84,), 120),
        "fc3_w": u(ks[8], (10, 84), 84),
        "fc3_b": u(ks[9], (10,), 84),
    }


def prepare_params(params):
    """One-time layout/dtype prep: flatten/transpose weights to kernel-ready (K, N) /
    (OC, K) layouts and cast matmul operands to bf16 (biases stay f32)."""
    bf = jnp.bfloat16
    f32 = jnp.float32
    return {
        "conv1_w": params["conv1_w"].reshape(6, -1).astype(bf),            # (6, 75)
        "conv1_b": params["conv1_b"].reshape(-1, 1).astype(f32),           # (6, 1)
        "conv2_w": params["conv2_w"].reshape(16, -1).astype(bf),           # (16, 150)
        "conv2_b": params["conv2_b"].reshape(-1, 1).astype(f32),           # (16, 1)
        "fc1_w": params["fc1_w"].T.astype(bf),                             # (400, 120)
        "fc1_b": params["fc1_b"].reshape(1, -1).astype(f32),               # (1, 120)
        "fc2_w": params["fc2_w"].T.astype(bf),                             # (120, 84)
        "fc2_b": params["fc2_b"].reshape(1, -1).astype(f32),               # (1, 84)
        "fc3_w": params["fc3_w"].T.astype(bf),                             # (84, 10)
        "fc3_b": params["fc3_b"].reshape(1, -1).astype(f32),               # (1, 10)
    }


# ---------------------------------------------------------------------------
# Forward pass (mirrors Net.forward)
# ---------------------------------------------------------------------------
def net_forward(kparams, x):
    """x: (B, 3, 32, 32) NCHW f32 -> logits (B, 10) f32."""
    x_cm = jnp.transpose(x, (1, 0, 2, 3))                   # (C, B, H, W), done once
    # x = self.pool(F.relu(self.conv1(x)))   (fused conv+bias+relu+pool kernel)
    a1 = conv_relu_pool(x_cm, kparams["conv1_w"], kparams["conv1_b"])    # (6, B, 14, 14)
    # x = self.pool(F.relu(self.conv2(x)))
    a2 = conv_relu_pool(a1, kparams["conv2_w"], kparams["conv2_b"])      # (16, B, 5, 5)
    # x = x.view(-1, 16*5*5): per-batch flatten in (C, H, W) order, same as PyTorch
    B = x.shape[0]
    a_flat = jnp.transpose(a2, (1, 0, 2, 3)).reshape(B, 16 * 5 * 5)      # (B, 400)
    # x = F.relu(fc1(x)); x = F.relu(fc2(x)); x = fc3(x)   (single fused kernel)
    return fc_fused(a_flat, kparams)


if __name__ == "__main__":
    key = jax.random.PRNGKey(0)
    pkey, xkey = jax.random.split(key)
    params = init_params(pkey)
    kparams = prepare_params(params)            # hoisted: no per-call transposes/casts
    # fc1 expects 16*5*5 features => input spatial must be 32x32, 3 channels.
    x = jax.random.normal(xkey, (2, 3, 32, 32), jnp.float32)

    fwd = jax.jit(net_forward)
    out = jax.block_until_ready(fwd(kparams, x))
    assert out.shape == (2, 10) and out.dtype == jnp.float32
    print("KERNEL_OK")
</pallas_src>

<mosaic_0001>
module attributes {stable_mosaic.version = 11 : i64} {
  func.func @_conv_pool_kernel(%arg0: memref<4x75x392xbf16, #tpu.memory_space<vmem>>, %arg1: memref<6x75xbf16, #tpu.memory_space<vmem>>, %arg2: memref<6x1xf32, #tpu.memory_space<vmem>>, %arg3: memref<6x392xbf16, #tpu.memory_space<vmem>>) attributes {dimension_semantics = [], scalar_prefetch = 0 : i64, scratch_operands = 0 : i64, tpu.core_type = #tpu.core_type<tc>} {
    %c0 = arith.constant 0 : index
    %c0_0 = arith.constant 0 : index
    %0 = vector.load %arg1[%c0, %c0_0] : memref<6x75xbf16, #tpu.memory_space<vmem>>, vector<6x75xbf16>
    %c0_1 = arith.constant 0 : index
    %c0_2 = arith.constant 0 : index
    %c0_3 = arith.constant 0 : index
    %1 = vector.load %arg0[%c0_1, %c0_2, %c0_3] : memref<4x75x392xbf16, #tpu.memory_space<vmem>>, vector<1x75x392xbf16>
    %2 = vector.shape_cast %1 : vector<1x75x392xbf16> to vector<75x392xbf16>
    %cst = arith.constant dense<0.000000e+00> : vector<6x392xf32>
    %3 = tpu.matmul %0, %2, %cst {dimension_numbers = #tpu.dot_dimension_numbers<[1], [0], [0], [1], [0, 0, 1, 1], [], []>} : vector<6x75xbf16>, vector<75x392xbf16>, vector<6x392xf32> -> vector<6x392xf32>
    %c1 = arith.constant 1 : index
    %c0_4 = arith.constant 0 : index
    %c0_5 = arith.constant 0 : index
    %4 = vector.load %arg0[%c1, %c0_4, %c0_5] : memref<4x75x392xbf16, #tpu.memory_space<vmem>>, vector<1x75x392xbf16>
    %5 = vector.shape_cast %4 : vector<1x75x392xbf16> to vector<75x392xbf16>
    %cst_6 = arith.constant dense<0.000000e+00> : vector<6x392xf32>
    %6 = tpu.matmul %0, %5, %cst_6 {dimension_numbers = #tpu.dot_dimension_numbers<[1], [0], [0], [1], [0, 0, 1, 1], [], []>} : vector<6x75xbf16>, vector<75x392xbf16>, vector<6x392xf32> -> vector<6x392xf32>
    %7 = arith.maximumf %3, %6 : vector<6x392xf32>
    %c2 = arith.constant 2 : index
    %c0_7 = arith.constant 0 : index
    %c0_8 = arith.constant 0 : index
    %8 = vector.load %arg0[%c2, %c0_7, %c0_8] : memref<4x75x392xbf16, #tpu.memory_space<vmem>>, vector<1x75x392xbf16>
    %9 = vector.shape_cast %8 : vector<1x75x392xbf16> to vector<75x392xbf16>
    %cst_9 = arith.constant dense<0.000000e+00> : vector<6x392xf32>
    %10 = tpu.matmul %0, %9, %cst_9 {dimension_numbers = #tpu.dot_dimension_numbers<[1], [0], [0], [1], [0, 0, 1, 1], [], []>} : vector<6x75xbf16>, vector<75x392xbf16>, vector<6x392xf32> -> vector<6x392xf32>
    %11 = arith.maximumf %7, %10 : vector<6x392xf32>
    %c3 = arith.constant 3 : index
    %c0_10 = arith.constant 0 : index
    %c0_11 = arith.constant 0 : index
    %12 = vector.load %arg0[%c3, %c0_10, %c0_11] : memref<4x75x392xbf16, #tpu.memory_space<vmem>>, vector<1x75x392xbf16>
    %13 = vector.shape_cast %12 : vector<1x75x392xbf16> to vector<75x392xbf16>
    %cst_12 = arith.constant dense<0.000000e+00> : vector<6x392xf32>
    %14 = tpu.matmul %0, %13, %cst_12 {dimension_numbers = #tpu.dot_dimension_numbers<[1], [0], [0], [1], [0, 0, 1, 1], [], []>} : vector<6x75xbf16>, vector<75x392xbf16>, vector<6x392xf32> -> vector<6x392xf32>
    %15 = arith.maximumf %11, %14 : vector<6x392xf32>
    %c0_13 = arith.constant 0 : index
    %c0_14 = arith.constant 0 : index
    %16 = vector.load %arg2[%c0_13, %c0_14] : memref<6x1xf32, #tpu.memory_space<vmem>>, vector<6x1xf32>
    %17 = vector.broadcast %16 : vector<6x1xf32> to vector<6x392xf32>
    %18 = arith.addf %15, %17 : vector<6x392xf32>
    %cst_15 = arith.constant 0.000000e+00 : f32
    %19 = vector.broadcast %cst_15 : f32 to vector<6x392xf32>
    %20 = arith.maximumf %18, %19 : vector<6x392xf32>
    %21 = arith.truncf %20 : vector<6x392xf32> to vector<6x392xbf16>
    %c0_16 = arith.constant 0 : index
    %c0_17 = arith.constant 0 : index
    %22 = vector.load %arg3[%c0_16, %c0_17] : memref<6x392xbf16, #tpu.memory_space<vmem>>, vector<6x392xbf16>
    tpu.vector_store %arg3[%c0_16, %c0_17], %21 {strides = array<i32>} : memref<6x392xbf16, #tpu.memory_space<vmem>>, vector<6x392xbf16>,
    return
  }
}

module attributes {stable_mosaic.version = 11 : i64} {
  func.func @_conv_pool_kernel(%arg0: memref<4x150x50xbf16, #tpu.memory_space<vmem>>, %arg1: memref<16x150xbf16, #tpu.memory_space<vmem>>, %arg2: memref<16x1xf32, #tpu.memory_space<vmem>>, %arg3: memref<16x50xbf16, #tpu.memory_space<vmem>>) attributes {dimension_semantics = [], scalar_prefetch = 0 : i64, scratch_operands = 0 : i64, tpu.core_type = #tpu.core_type<tc>} {
    %c0 = arith.constant 0 : index
    %c0_0 = arith.constant 0 : index
    %0 = vector.load %arg1[%c0, %c0_0] : memref<16x150xbf16, #tpu.memory_space<vmem>>, vector<16x150xbf16>
    %c0_1 = arith.constant 0 : index
    %c0_2 = arith.constant 0 : index
    %c0_3 = arith.constant 0 : index
    %1 = vector.load %arg0[%c0_1, %c0_2, %c0_3] : memref<4x150x50xbf16, #tpu.memory_space<vmem>>, vector<1x150x50xbf16>
    %2 = vector.shape_cast %1 : vector<1x150x50xbf16> to vector<150x50xbf16>
    %cst = arith.constant dense<0.000000e+00> : vector<16x50xf32>
    %3 = tpu.matmul %0, %2, %cst {dimension_numbers = #tpu.dot_dimension_numbers<[1], [0], [0], [1], [0, 0, 1, 1], [], []>} : vector<16x150xbf16>, vector<150x50xbf16>, vector<16x50xf32> -> vector<16x50xf32>
    %c1 = arith.constant 1 : index
    %c0_4 = arith.constant 0 : index
    %c0_5 = arith.constant 0 : index
    %4 = vector.load %arg0[%c1, %c0_4, %c0_5] : memref<4x150x50xbf16, #tpu.memory_space<vmem>>, vector<1x150x50xbf16>
    %5 = vector.shape_cast %4 : vector<1x150x50xbf16> to vector<150x50xbf16>
    %cst_6 = arith.constant dense<0.000000e+00> : vector<16x50xf32>
    %6 = tpu.matmul %0, %5, %cst_6 {dimension_numbers = #tpu.dot_dimension_numbers<[1], [0], [0], [1], [0, 0, 1, 1], [], []>} : vector<16x150xbf16>, vector<150x50xbf16>, vector<16x50xf32> -> vector<16x50xf32>
    %7 = arith.maximumf %3, %6 : vector<16x50xf32>
    %c2 = arith.constant 2 : index
    %c0_7 = arith.constant 0 : index
    %c0_8 = arith.constant 0 : index
    %8 = vector.load %arg0[%c2, %c0_7, %c0_8] : memref<4x150x50xbf16, #tpu.memory_space<vmem>>, vector<1x150x50xbf16>
    %9 = vector.shape_cast %8 : vector<1x150x50xbf16> to vector<150x50xbf16>
    %cst_9 = arith.constant dense<0.000000e+00> : vector<16x50xf32>
    %10 = tpu.matmul %0, %9, %cst_9 {dimension_numbers = #tpu.dot_dimension_numbers<[1], [0], [0], [1], [0, 0, 1, 1], [], []>} : vector<16x150xbf16>, vector<150x50xbf16>, vector<16x50xf32> -> vector<16x50xf32>
    %11 = arith.maximumf %7, %10 : vector<16x50xf32>
    %c3 = arith.constant 3 : index
    %c0_10 = arith.constant 0 : index
    %c0_11 = arith.constant 0 : index
    %12 = vector.load %arg0[%c3, %c0_10, %c0_11] : memref<4x150x50xbf16, #tpu.memory_space<vmem>>, vector<1x150x50xbf16>
    %13 = vector.shape_cast %12 : vector<1x150x50xbf16> to vector<150x50xbf16>
    %cst_12 = arith.constant dense<0.000000e+00> : vector<16x50xf32>
    %14 = tpu.matmul %0, %13, %cst_12 {dimension_numbers = #tpu.dot_dimension_numbers<[1], [0], [0], [1], [0, 0, 1, 1], [], []>} : vector<16x150xbf16>, vector<150x50xbf16>, vector<16x50xf32> -> vector<16x50xf32>
    %15 = arith.maximumf %11, %14 : vector<16x50xf32>
    %c0_13 = arith.constant 0 : index
    %c0_14 = arith.constant 0 : index
    %16 = vector.load %arg2[%c0_13, %c0_14] : memref<16x1xf32, #tpu.memory_space<vmem>>, vector<16x1xf32>
    %17 = vector.broadcast %16 : vector<16x1xf32> to vector<16x50xf32>
    %18 = arith.addf %15, %17 : vector<16x50xf32>
    %cst_15 = arith.constant 0.000000e+00 : f32
    %19 = vector.broadcast %cst_15 : f32 to vector<16x50xf32>
    %20 = arith.maximumf %18, %19 : vector<16x50xf32>
    %21 = arith.truncf %20 : vector<16x50xf32> to vector<16x50xbf16>
    %c0_16 = arith.constant 0 : index
    %c0_17 = arith.constant 0 : index
    %22 = vector.load %arg3[%c0_16, %c0_17] : memref<16x50xbf16, #tpu.memory_space<vmem>>, vector<16x50xbf16>
    tpu.vector_store %arg3[%c0_16, %c0_17], %21 {strides = array<i32>} : memref<16x50xbf16, #tpu.memory_space<vmem>>, vector<16x50xbf16>,
    return
  }
}

module attributes {stable_mosaic.version = 11 : i64} {
  func.func @_fc3_kernel(%arg0: memref<2x400xbf16, #tpu.memory_space<vmem>>, %arg1: memref<400x120xbf16, #tpu.memory_space<vmem>>, %arg2: memref<1x120xf32, #tpu.memory_space<vmem>>, %arg3: memref<120x84xbf16, #tpu.memory_space<vmem>>, %arg4: memref<1x84xf32, #tpu.memory_space<vmem>>, %arg5: memref<84x10xbf16, #tpu.memory_space<vmem>>, %arg6: memref<1x10xf32, #tpu.memory_space<vmem>>, %arg7: memref<2x10xf32, #tpu.memory_space<vmem>>) attributes {dimension_semantics = [], scalar_prefetch = 0 : i64, scratch_operands = 0 : i64, tpu.core_type = #tpu.core_type<tc>} {
    %c0 = arith.constant 0 : index
    %c0_0 = arith.constant 0 : index
    %0 = vector.load %arg0[%c0, %c0_0] : memref<2x400xbf16, #tpu.memory_space<vmem>>, vector<2x400xbf16>
    %c0_1 = arith.constant 0 : index
    %c0_2 = arith.constant 0 : index
    %1 = vector.load %arg1[%c0_1, %c0_2] : memref<400x120xbf16, #tpu.memory_space<vmem>>, vector<400x120xbf16>
    %cst = arith.constant dense<0.000000e+00> : vector<2x120xf32>
    %2 = tpu.matmul %0, %1, %cst {dimension_numbers = #tpu.dot_dimension_numbers<[1], [0], [0], [1], [0, 0, 1, 1], [], []>} : vector<2x400xbf16>, vector<400x120xbf16>, vector<2x120xf32> -> vector<2x120xf32>
    %c0_3 = arith.constant 0 : index
    %c0_4 = arith.constant 0 : index
    %3 = vector.load %arg2[%c0_3, %c0_4] : memref<1x120xf32, #tpu.memory_space<vmem>>, vector<1x120xf32>
    %4 = vector.broadcast %3 : vector<1x120xf32> to vector<2x120xf32>
    %5 = arith.addf %2, %4 : vector<2x120xf32>
    %cst_5 = arith.constant 0.000000e+00 : f32
    %6 = vector.broadcast %cst_5 : f32 to vector<2x120xf32>
    %7 = arith.maximumf %5, %6 : vector<2x120xf32>
    %8 = arith.truncf %7 : vector<2x120xf32> to vector<2x120xbf16>
    %c0_6 = arith.constant 0 : index
    %c0_7 = arith.constant 0 : index
    %9 = vector.load %arg3[%c0_6, %c0_7] : memref<120x84xbf16, #tpu.memory_space<vmem>>, vector<120x84xbf16>
    %cst_8 = arith.constant dense<0.000000e+00> : vector<2x84xf32>
    %10 = tpu.matmul %8, %9, %cst_8 {dimension_numbers = #tpu.dot_dimension_numbers<[1], [0], [0], [1], [0, 0, 1, 1], [], []>} : vector<2x120xbf16>, vector<120x84xbf16>, vector<2x84xf32> -> vector<2x84xf32>
    %c0_9 = arith.constant 0 : index
    %c0_10 = arith.constant 0 : index
    %11 = vector.load %arg4[%c0_9, %c0_10] : memref<1x84xf32, #tpu.memory_space<vmem>>, vector<1x84xf32>
    %12 = vector.broadcast %11 : vector<1x84xf32> to vector<2x84xf32>
    %13 = arith.addf %10, %12 : vector<2x84xf32>
    %cst_11 = arith.constant 0.000000e+00 : f32
    %14 = vector.broadcast %cst_11 : f32 to vector<2x84xf32>
    %15 = arith.maximumf %13, %14 : vector<2x84xf32>
    %16 = arith.truncf %15 : vector<2x84xf32> to vector<2x84xbf16>
    %c0_12 = arith.constant 0 : index
    %c0_13 = arith.constant 0 : index
    %17 = vector.load %arg5[%c0_12, %c0_13] : memref<84x10xbf16, #tpu.memory_space<vmem>>, vector<84x10xbf16>
    %cst_14 = arith.constant dense<0.000000e+00> : vector<2x10xf32>
    %18 = tpu.matmul %16, %17, %cst_14 {dimension_numbers = #tpu.dot_dimension_numbers<[1], [0], [0], [1], [0, 0, 1, 1], [], []>} : vector<2x84xbf16>, vector<84x10xbf16>, vector<2x10xf32> -> vector<2x10xf32>
    %c0_15 = arith.constant 0 : index
    %c0_16 = arith.constant 0 : index
    %19 = vector.load %arg6[%c0_15, %c0_16] : memref<1x10xf32, #tpu.memory_space<vmem>>, vector<1x10xf32>
    %20 = vector.broadcast %19 : vector<1x10xf32> to vector<2x10xf32>
    %21 = arith.addf %18, %20 : vector<2x10xf32>
    %c0_17 = arith.constant 0 : index
    %c0_18 = arith.constant 0 : index
    %22 = vector.load %arg7[%c0_17, %c0_18] : memref<2x10xf32, #tpu.memory_space<vmem>>, vector<2x10xf32>
    tpu.vector_store %arg7[%c0_17, %c0_18], %21 {strides = array<i32>} : memref<2x10xf32, #tpu.memory_space<vmem>>, vector<2x10xf32>,
    return
  }
}

</mosaic_0001>

<bundles_post_ra>
// kernel: net_forward.3
= control target key start
LH: loop header
LB: loop body
LE: loop exit
PB: predicated region body
PF: predicated region fallthrough
CT: control target
= control target key end

     0   :  { %vm136_vm0 = vcmask 1044480   ;;  %vm137_vm1 = vcmask 1045504   ;;  %v1263_v2 = vmov 65535   ;;  %vm132_vm2 = vcmask 613376   ;;  %s1829_s0 = inlined_call_operand.vmem [shape: bf16[4,75,392], index: 0, kind: input, shape index: {}]   ;;  %s1830_s1 = inlined_call_operand.vmem [shape: bf16[6,75], index: 1, kind: input, shape index: {}]   ;;  %s1831_s2 = inlined_call_operand.vmem [shape: f32[6,1], index: 2, kind: input, shape index: {}]   ;;  %s1832_s3 = inlined_call_operand.vmem [shape: bf16[6,392], index: 3, kind: output, shape index: {}]  }
   0x1   :  { %v850_v0 = vld [vmem:[%s1829_s0 + $0x80] sm:$0xf]  ;;  %v1198_v1 = vld [vmem:[%s1829_s0 + $0x8c] sm:$0x30]  ;;  %v138_v3 = vsel %vm136_vm0, 4294967295, %v1263_v2  ;;  %vm776_vm3 = vcmask 1042432  }
   0x2   :  { %v851_v4 = vor.u32 %v1198_v1, %v850_v0  ;;  %v1291_v5 = vsel %vm137_vm1, %v138_v3, 0  ;;  %v1196_v6 = vld [vmem:[%s1829_s0 + $0x84] sm:$0xf]  ;;  %v852_v7 = vld [vmem:[%s1829_s0 + $0x90] sm:$0x30]  ;;  %vm777_vm4 = vcmask 63492  }
   0x3   :  { %v855_v8 = vor.u32 %v1196_v6, %v852_v7  ;;  %v858_v9 = vld [vmem:[%s1829_s0 + $0x88] sm:$0xf]  ;;  %v1199_v10 = vld [vmem:[%s1829_s0 + $0x94] sm:$0x30]  ;;  %v1197_v11 = vld [vmem:[%s1829_s0 + $0x8c] sm:$0xf] }
   0x4   :  { %v141_v12 = vand.u32 %v851_v4, %v1291_v5  ;;  %v859_v13 = vor.u32 %v1199_v10, %v858_v9  ;;  %v860_v14 = vld [vmem:[%s1829_s0 + $0x98] sm:$0x30]  ;;  %v834_v15 = vld [vmem:[%s1829_s0 + $0x60] sm:$0xf]  ;;  %v1194_v16 = vld [vmem:[%s1829_s0 + $0x6c] sm:$0xf0] }
   0x5   :  { %v144_v17 = vand.u32 %v855_v8, %v1291_v5  ;;  %v863_v18 = vor.u32 %v1197_v11, %v860_v14  ;;  %v1192_v19 = vld [vmem:[%s1829_s0 + $0x64] sm:$0xf]  ;;  %v836_v20 = vld [vmem:[%s1829_s0 + $0x70] sm:$0xf0]  ;;  %v842_v21 = vld [vmem:[%s1829_s0 + $0x68] sm:$0xf]  ;;  %v835_v23 = vor.u32 %v1194_v16, %v834_v15 }
   0x6   :  { %155 = vmatpush.bf16.msra.mxu0 %v141_v12  ;;  %v147_v22 = vand.u32 %v859_v13, %v1291_v5  ;;  %v1195_v24 = vld [vmem:[%s1829_s0 + $0x74] sm:$0xf0]  ;;  %v1193_v25 = vld [vmem:[%s1829_s0 + $0x6c] sm:$0xf]  ;;  %v844_v26 = vld [vmem:[%s1829_s0 + $0x78] sm:$0xf0]  ;;  %v839_v28 = vor.u32 %v1192_v19, %v836_v20 }
   0x7   :  { %168 = vmatpush.bf16.msra.mxu1 %v144_v17  ;;  %v150_v27 = vand.u32 %v863_v18, %v1291_v5  ;;  %v818_v29 = vld [vmem:[%s1829_s0 + $0x40] sm:$0xf]  ;;  %v1190_v30 = vld [vmem:[%s1829_s0 + $0x4c] sm:$0xf0]  ;;  %v843_v31 = vor.u32 %v1195_v24, %v842_v21  ;;  %v1188_v32 = vld [vmem:[%s1829_s0 + $0x44] sm:$0xf]  ;;  %v847_v34 = vor.u32 %v1193_v25, %v844_v26 }
   0x8   :  { %181 = vmatpush.bf16.msra.mxu2 %v147_v22  ;;  %v820_v33 = vld [vmem:[%s1829_s0 + $0x50] sm:$0xf0]  ;;  %v826_v35 = vld [vmem:[%s1829_s0 + $0x48] sm:$0xf]  ;;  %v1191_v36 = vld [vmem:[%s1829_s0 + $0x54] sm:$0xf0]  ;;  %v819_v37 = vor.u32 %v1190_v30, %v818_v29 }
   0x9   :  { %194 = vmatpush.bf16.msra.mxu3 %v150_v27  ;;  %v1189_v38 = vld [vmem:[%s1829_s0 + $0x4c] sm:$0xf]  ;;  %v828_v39 = vld [vmem:[%s1829_s0 + $0x58] sm:$0xf0]  ;;  %v823_v40 = vor.u32 %v1188_v32, %v820_v33  ;;  %v802_v41 = vld [vmem:[%s1829_s0 + $0x20] sm:$0xf]  ;;  %v827_v44 = vor.u32 %v1191_v36, %v826_v35 }
   0xa   :  { %156 = vmatpush.bf16.msra.mxu0 %v835_v23  ;;  %v1186_v42 = vld [vmem:[%s1829_s0 + $0x2c] sm:$0xf0]  ;;  %v1184_v43 = vld [vmem:[%s1829_s0 + $0x24] sm:$0xf]  ;;  %v804_v45 = vld [vmem:[%s1829_s0 + $0x30] sm:$0xf0]  ;;  %v831_v48 = vor.u32 %v1189_v38, %v828_v39 }
   0xb   :  { %169 = vmatpush.bf16.msra.mxu1 %v839_v28  ;;  %v810_v46 = vld [vmem:[%s1829_s0 + $0x28] sm:$0xf]  ;;  %v1187_v47 = vld [vmem:[%s1829_s0 + $0x34] sm:$0xf0]  ;;  %v1185_v49 = vld [vmem:[%s1829_s0 + $0x2c] sm:$0xf]  ;;  %v803_v52 = vor.u32 %v1186_v42, %v802_v41  ;;  %v807_v56 = vor.u32 %v1184_v43, %v804_v45 }
   0xc   :  { %182 = vmatpush.bf16.msra.mxu2 %v843_v31  ;;  %v812_v50 = vld [vmem:[%s1829_s0 + $0x38] sm:$0xf0]  ;;  %v786_v51 = vld [vmem:[%s1829_s0] sm:$0xf]  ;;  %v1182_v53 = vld [vmem:[%s1829_s0 + $0xc] sm:$0xf0]  ;;  %v811_v61 = vor.u32 %v1187_v47, %v810_v46 }
   0xd   :  { %195 = vmatpush.bf16.msra.mxu3 %v847_v34  ;;  %v1180_v54 = vld [vmem:[%s1829_s0 + $0x4] sm:$0xf]  ;;  %v788_v55 = vld [vmem:[%s1829_s0 + $0x10] sm:$0xf0]  ;;  %v794_v57 = vld [vmem:[%s1829_s0 + $0x8] sm:$0xf]  ;;  %v815_v2 = vor.u32 %v1185_v49, %v812_v50  ;;  %v787_v9 = vor.u32 %v1182_v53, %v786_v51 }
   0xe   :  { %157 = vmatpush.bf16.msra.mxu0 %v819_v37  ;;  %v954_v58 = vld [vmem:[%s1829_s0 + $0x120] sm:$0xf]  ;;  %v1218_v59 = vld [vmem:[%s1829_s0 + $0x12c] sm:$0x30]  ;;  %v1216_v60 = vld [vmem:[%s1829_s0 + $0x124] sm:$0xf]  ;;  %v791_v13 = vor.u32 %v1180_v54, %v788_v55 }
   0xf   :  { %170 = vmatpush.bf16.msra.mxu1 %v823_v40  ;;  %v955_v62 = vor.u32 %v1218_v59, %v954_v58  ;;  %v956_v63 = vld [vmem:[%s1829_s0 + $0x130] sm:$0x30]  ;;  %v962_v0 = vld [vmem:[%s1829_s0 + $0x128] sm:$0xf]  ;;  %v1219_v1 = vld [vmem:[%s1829_s0 + $0x134] sm:$0x30] }
  0x10   :  { %183 = vmatpush.bf16.msra.mxu2 %v827_v44  ;;  %v1183_v3 = vld [vmem:[%s1829_s0 + $0x14] sm:$0xf0]  ;;  %v959_v4 = vor.u32 %v1216_v60, %v956_v63  ;;  %v963_v6 = vor.u32 %v1219_v1, %v962_v0  ;;  %v1217_v7 = vld [vmem:[%s1829_s0 + $0x12c] sm:$0xf]  ;;  %v964_v8 = vld [vmem:[%s1829_s0 + $0x138] sm:$0x30] }
  0x11   :  { %196 = vmatpush.bf16.msra.mxu3 %v831_v48  ;;  %v1181_v10 = vld [vmem:[%s1829_s0 + $0xc] sm:$0xf]  ;;  %v796_v11 = vld [vmem:[%s1829_s0 + $0x18] sm:$0xf0]  ;;  %v967_v12 = vor.u32 %v1217_v7, %v964_v8  ;;  %v322_v14 = vand.u32 %v955_v62, %v1291_v5  ;;  %v795_v15 = vor.u32 %v1183_v3, %v794_v57  ;;  %v938_v19 = vld [vmem:[%s1829_s0 + $0x100] sm:$0xf] }
  0x12   :  { %158 = vmatpush.bf16.msra.mxu0 %v803_v52  ;;  %v325_v16 = vand.u32 %v959_v4, %v1291_v5  ;;  %v799_v17 = vor.u32 %v1181_v10, %v796_v11  ;;  %v328_v18 = vand.u32 %v963_v6, %v1291_v5  ;;  %v1214_v20 = vld [vmem:[%s1829_s0 + $0x10c] sm:$0xf0]  ;;  %v1212_v21 = vld [vmem:[%s1829_s0 + $0x104] sm:$0xf]  ;;  %v940_v23 = vld [vmem:[%s1829_s0 + $0x110] sm:$0xf0] }
  0x13   :  { %171 = vmatpush.bf16.msra.mxu1 %v807_v56  ;;  %v331_v22 = vand.u32 %v967_v12, %v1291_v5  ;;  %v946_v24 = vld [vmem:[%s1829_s0 + $0x108] sm:$0xf]  ;;  %v1215_v25 = vld [vmem:[%s1829_s0 + $0x114] sm:$0xf0]  ;;  %v1460_v26 = vld [vmem:[%s1830_s1] sm:$0x7]  ;;  %v939_v29 = vor.u32 %v1214_v20, %v938_v19  ;;  %v943_v30 = vor.u32 %v1212_v21, %v940_v23 }
  0x14   :  { %184 = vmatpush.bf16.msra.mxu2 %v811_v61  ;;  %v1213_v27 = vld [vmem:[%s1829_s0 + $0x10c] sm:$0xf]  ;;  %v948_v28 = vld [vmem:[%s1829_s0 + $0x118] sm:$0xf0]  ;;  %v947_v31 = vor.u32 %v1215_v25, %v946_v24  ;;  %v922_v32 = vld [vmem:[%s1829_s0 + $0xe0] sm:$0xf] }
  0x15   :  { %197 = vmatpush.bf16.msra.mxu3 %v815_v2  ;;  %v1210_v33 = vld [vmem:[%s1829_s0 + $0xec] sm:$0xf0]  ;;  %v1208_v34 = vld [vmem:[%s1829_s0 + $0xe4] sm:$0xf]  ;;  %v951_v35 = vor.u32 %v1213_v27, %v948_v28  ;;  %v924_v36 = vld [vmem:[%s1829_s0 + $0xf0] sm:$0xf0] }
  0x16   :  { %159 = vmatpush.bf16.msra.mxu0 %v787_v9  ;;  %v930_v37 = vld [vmem:[%s1829_s0 + $0xe8] sm:$0xf]  ;;  %v1211_v38 = vld [vmem:[%s1829_s0 + $0xf4] sm:$0xf0]  ;;  %v1209_v39 = vld [vmem:[%s1829_s0 + $0xec] sm:$0xf]  ;;  %v923_v41 = vor.u32 %v1210_v33, %v922_v32  ;;  %v927_v44 = vor.u32 %v1208_v34, %v924_v36 }
  0x17   :  { %172 = vmatpush.bf16.msra.mxu1 %v791_v13  ;;  %v932_v40 = vld [vmem:[%s1829_s0 + $0xf8] sm:$0xf0]  ;;  %v906_v42 = vld [vmem:[%s1829_s0 + $0xc0] sm:$0xf]  ;;  %v1206_v43 = vld [vmem:[%s1829_s0 + $0xcc] sm:$0xf0]  ;;  %v931_v45 = vor.u32 %v1211_v38, %v930_v37 }
  0x18   :  { %185 = vmatpush.bf16.msra.mxu2 %v795_v15  ;;  %v1204_v46 = vld [vmem:[%s1829_s0 + $0xc4] sm:$0xf]  ;;  %v908_v47 = vld [vmem:[%s1829_s0 + $0xd0] sm:$0xf0]  ;;  %v914_v48 = vld [vmem:[%s1829_s0 + $0xc8] sm:$0xf]  ;;  %v935_v49 = vor.u32 %v1209_v39, %v932_v40  ;;  %v907_v58 = vor.u32 %v1206_v43, %v906_v42 }
  0x19   :  { %198 = vmatpush.bf16.msra.mxu3 %v799_v17  ;;  %864 = vmatmul.msk.bf16.vlgmr.msra.gmra.mxu0 %vm132_vm2, %v1460_v26  ;;  %v1207_v50 = vld [vmem:[%s1829_s0 + $0xd4] sm:$0xf0]  ;;  %v1205_v51 = vld [vmem:[%s1829_s0 + $0xcc] sm:$0xf]  ;;  %v916_v52 = vld [vmem:[%s1829_s0 + $0xd8] sm:$0xf0]  ;;  %v911_v62 = vor.u32 %v1204_v46, %v908_v47 }
  0x1a   :  { %336 = vmatpush.bf16.msrb.mxu0 %v322_v14  ;;  %865 = vmatmul.msk.bf16.vlgmr.msra.gmra.mxu1 %vm132_vm2, %v1460_v26  ;;  %v890_v53 = vld [vmem:[%s1829_s0 + $0xa0] sm:$0xf]  ;;  %v1202_v54 = vld [vmem:[%s1829_s0 + $0xac] sm:$0xf0]  ;;  %v1236_v57 = vld [vmem:[%s1829_s0 + $0x1c4] sm:$0xf]  ;;  %v915_v63 = vor.u32 %v1207_v50, %v914_v48  ;;  %v919_v3 = vor.u32 %v1205_v51, %v916_v52 }
  0x1b   :  { %349 = vmatpush.bf16.msrb.mxu1 %v325_v16  ;;  %866 = vmatmul.msk.bf16.vlgmr.msra.gmra.mxu2 %vm132_vm2, %v1460_v26  ;;  %v1058_v55 = vld [vmem:[%s1829_s0 + $0x1c0] sm:$0xf]  ;;  %v1238_v56 = vld [vmem:[%s1829_s0 + $0x1cc] sm:$0x30]  ;;  %v1060_v59 = vld [vmem:[%s1829_s0 + $0x1d0] sm:$0x30]  ;;  %v891_v13 = vor.u32 %v1202_v54, %v890_v53 }
  0x1c   :  { %362 = vmatpush.bf16.msrb.mxu2 %v328_v18  ;;  %867 = vmatmul.msk.bf16.vlgmr.msra.gmra.mxu3 %vm132_vm2, %v1460_v26  ;;  %v1066_v60 = vld [vmem:[%s1829_s0 + $0x1c8] sm:$0xf]  ;;  %v1239_v61 = vld [vmem:[%s1829_s0 + $0x1d4] sm:$0x30]  ;;  %v1200_v0 = vld [vmem:[%s1829_s0 + $0xa4] sm:$0xf]  ;;  %v1059_v8 = vor.u32 %v1238_v56, %v1058_v55  ;;  %v1063_v11 = vor.u32 %v1236_v57, %v1060_v59 }
  0x1d   :  { %375 = vmatpush.bf16.msrb.mxu3 %v331_v22  ;;  %v1237_v1 = vld [vmem:[%s1829_s0 + $0x1cc] sm:$0xf]  ;;  %v1068_v2 = vld [vmem:[%s1829_s0 + $0x1d8] sm:$0x30]  ;;  %v892_v4 = vld [vmem:[%s1829_s0 + $0xb0] sm:$0xf0]  ;;  %v1067_v12 = vor.u32 %v1239_v61, %v1066_v60 }
  0x1e   :  { %337 = vmatpush.bf16.msrb.mxu0 %v939_v29  ;;  %v898_v6 = vld [vmem:[%s1829_s0 + $0xa8] sm:$0xf]  ;;  %v1203_v7 = vld [vmem:[%s1829_s0 + $0xb4] sm:$0xf0]  ;;  %v1201_v9 = vld [vmem:[%s1829_s0 + $0xac] sm:$0xf]  ;;  %v1071_v14 = vor.u32 %v1237_v1, %v1068_v2  ;;  %v895_v15 = vor.u32 %v1200_v0, %v892_v4  ;;  %v507_v18 = vand.u32 %v1059_v8, %v1291_v5  ;;  %v510_v19 = vand.u32 %v1063_v11, %v1291_v5 }
  0x1f   :  { %350 = vmatpush.bf16.msrb.mxu1 %v943_v30  ;;  %v900_v10 = vld [vmem:[%s1829_s0 + $0xb8] sm:$0xf0]  ;;  %v899_v16 = vor.u32 %v1203_v7, %v898_v6  ;;  %v513_v20 = vand.u32 %v1067_v12, %v1291_v5  ;;  %v1042_v21 = vld [vmem:[%s1829_s0 + $0x1a0] sm:$0xf]  ;;  %v1234_v22 = vld [vmem:[%s1829_s0 + $0x1ac] sm:$0xf0] }
  0x20   :  { %363 = vmatpush.bf16.msrb.mxu2 %v947_v31  ;;  %v903_v17 = vor.u32 %v1201_v9, %v900_v10  ;;  %v1232_v23 = vld [vmem:[%s1829_s0 + $0x1a4] sm:$0xf]  ;;  %v516_v24 = vand.u32 %v1071_v14, %v1291_v5  ;;  %v1044_v25 = vld [vmem:[%s1829_s0 + $0x1b0] sm:$0xf0]  ;;  %v1050_v27 = vld [vmem:[%s1829_s0 + $0x1a8] sm:$0xf]  ;;  %v1043_v31 = vor.u32 %v1234_v22, %v1042_v21 }
  0x21   :  { %376 = vmatpush.bf16.msrb.mxu3 %v951_v35  ;;  %v1235_v28 = vld [vmem:[%s1829_s0 + $0x1b4] sm:$0xf0]  ;;  %v1233_v29 = vld [vmem:[%s1829_s0 + $0x1ac] sm:$0xf]  ;;  %v1052_v30 = vld [vmem:[%s1829_s0 + $0x1b8] sm:$0xf0]  ;;  %v1047_v32 = vor.u32 %v1232_v23, %v1044_v25 }
  0x22   :  { %338 = vmatpush.bf16.msrb.mxu0 %v923_v41  ;;  %v1051_v33 = vor.u32 %v1235_v28, %v1050_v27  ;;  %v1026_v34 = vld [vmem:[%s1829_s0 + $0x180] sm:$0xf]  ;;  %v1230_v35 = vld [vmem:[%s1829_s0 + $0x18c] sm:$0xf0]  ;;  %v1228_v36 = vld [vmem:[%s1829_s0 + $0x184] sm:$0xf]  ;;  %v1055_v37 = vor.u32 %v1233_v29, %v1052_v30 }
  0x23   :  { %351 = vmatpush.bf16.msrb.mxu1 %v927_v44  ;;  %v1028_v38 = vld [vmem:[%s1829_s0 + $0x190] sm:$0xf0]  ;;  %v1034_v39 = vld [vmem:[%s1829_s0 + $0x188] sm:$0xf]  ;;  %v1231_v40 = vld [vmem:[%s1829_s0 + $0x194] sm:$0xf0]  ;;  %v1027_v43 = vor.u32 %v1230_v35, %v1026_v34 }
  0x24   :  { %364 = vmatpush.bf16.msrb.mxu2 %v931_v45  ;;  %v1229_v41 = vld [vmem:[%s1829_s0 + $0x18c] sm:$0xf]  ;;  %v1036_v42 = vld [vmem:[%s1829_s0 + $0x198] sm:$0xf0]  ;;  %v1010_v44 = vld [vmem:[%s1829_s0 + $0x160] sm:$0xf]  ;;  %v1031_v46 = vor.u32 %v1228_v36, %v1028_v38  ;;  %v1035_v47 = vor.u32 %v1231_v40, %v1034_v39 }
  0x25   :  { %377 = vmatpush.bf16.msrb.mxu3 %v935_v49  ;;  %v1226_v45 = vld [vmem:[%s1829_s0 + $0x16c] sm:$0xf0]  ;;  %v1224_v48 = vld [vmem:[%s1829_s0 + $0x164] sm:$0xf]  ;;  %v1012_v49 = vld [vmem:[%s1829_s0 + $0x170] sm:$0xf0]  ;;  %v1039_v51 = vor.u32 %v1229_v41, %v1036_v42 }
  0x26   :  { %339 = vmatpush.bf16.msrb.mxu0 %v907_v58  ;;  %v1018_v50 = vld [vmem:[%s1829_s0 + $0x168] sm:$0xf]  ;;  %v1227_v52 = vld [vmem:[%s1829_s0 + $0x174] sm:$0xf0]  ;;  %v1225_v53 = vld [vmem:[%s1829_s0 + $0x16c] sm:$0xf]  ;;  %v1011_v60 = vor.u32 %v1226_v45, %v1010_v44  ;;  %v1015_v0 = vor.u32 %v1224_v48, %v1012_v49 }
  0x27   :  { %352 = vmatpush.bf16.msrb.mxu1 %v911_v62  ;;  %v1020_v54 = vld [vmem:[%s1829_s0 + $0x178] sm:$0xf0]  ;;  %v994_v55 = vld [vmem:[%s1829_s0 + $0x140] sm:$0xf]  ;;  %v1222_v56 = vld [vmem:[%s1829_s0 + $0x14c] sm:$0xf0]  ;;  %v1019_v1 = vor.u32 %v1227_v52, %v1018_v50 }
  0x28   :  { %365 = vmatpush.bf16.msrb.mxu2 %v915_v63  ;;  %v1162_v57 = vld [vmem:[%s1829_s0 + $0x260] sm:$0xf]  ;;  %v1258_v58 = vld [vmem:[%s1829_s0 + $0x26c] sm:$0x30]  ;;  %v1256_v59 = vld [vmem:[%s1829_s0 + $0x264] sm:$0xf]  ;;  %v1023_v6 = vor.u32 %v1225_v53, %v1020_v54 }
  0x29   :  { %378 = vmatpush.bf16.msrb.mxu3 %v919_v3  ;;  %v1164_v61 = vld [vmem:[%s1829_s0 + $0x270] sm:$0x30]  ;;  %v1170_v62 = vld [vmem:[%s1829_s0 + $0x268] sm:$0xf]  ;;  %v1259_v63 = vld [vmem:[%s1829_s0 + $0x274] sm:$0x30]  ;;  %v1163_v10 = vor.u32 %v1258_v58, %v1162_v57 }
  0x2a   :  { %340 = vmatpush.bf16.msrb.mxu0 %v891_v13  ;;  %v1220_v2 = vld [vmem:[%s1829_s0 + $0x144] sm:$0xf]  ;;  %v1257_v3 = vld [vmem:[%s1829_s0 + $0x26c] sm:$0xf]  ;;  %v1172_v4 = vld [vmem:[%s1829_s0 + $0x278] sm:$0x30]  ;;  %v1167_v13 = vor.u32 %v1256_v59, %v1164_v61  ;;  %v1171_v14 = vor.u32 %v1259_v63, %v1170_v62 }
  0x2b   :  { %353 = vmatpush.bf16.msrb.mxu1 %v895_v15  ;;  %v996_v7 = vld [vmem:[%s1829_s0 + $0x150] sm:$0xf0]  ;;  %v1002_v8 = vld [vmem:[%s1829_s0 + $0x148] sm:$0xf]  ;;  %v1223_v9 = vld [vmem:[%s1829_s0 + $0x154] sm:$0xf0]  ;;  %v995_v15 = vor.u32 %v1222_v56, %v994_v55  ;;  %v692_v21 = vand.u32 %v1163_v10, %v1291_v5 }
  0x2c   :  { %366 = vmatpush.bf16.msrb.mxu2 %v899_v16  ;;  %v1221_v11 = vld [vmem:[%s1829_s0 + $0x14c] sm:$0xf]  ;;  %v1004_v12 = vld [vmem:[%s1829_s0 + $0x158] sm:$0xf0]  ;;  %v1175_v16 = vor.u32 %v1257_v3, %v1172_v4  ;;  %v1264_v22 = vmov 0   ;;  %v695_v23 = vand.u32 %v1167_v13, %v1291_v5  ;;  %vm778_vm5 = vmor %vm777_vm4, %vm776_vm3 }
  0x2d   :  { %379 = vmatpush.bf16.msrb.mxu3 %v903_v17  ;;  %968 = vmatmul.msk.bf16.vlgmr.msrb.gmra.mxu0 %vm132_vm2, %v1460_v26  ;;  %v999_v17 = vor.u32 %v1220_v2, %v996_v7  ;;  %v1146_v25 = vld [vmem:[%s1829_s0 + $0x240] sm:$0xf]  ;;  %v1254_v27 = vld [vmem:[%s1829_s0 + $0x24c] sm:$0xf0]  ;;  %v1252_v28 = vld [vmem:[%s1829_s0 + $0x244] sm:$0xf] }
  0x2e   :  { %521 = vmatpush.bf16.msra.mxu0 %v507_v18  ;;  %969 = vmatmul.msk.bf16.vlgmr.msrb.gmra.mxu1 %vm132_vm2, %v1460_v26  ;;  %v1003_v18 = vor.u32 %v1223_v9, %v1002_v8  ;;  %v701_v29 = vand.u32 %v1175_v16, %v1291_v5  ;;  %v1148_v30 = vld [vmem:[%s1829_s0 + $0x250] sm:$0xf0]  ;;  %v1147_v34 = vor.u32 %v1254_v27, %v1146_v25  ;;  %v1250_v38 = vld [vmem:[%s1829_s0 + $0x22c] sm:$0xf0]  ;;  %v1248_v39 = vld [vmem:[%s1829_s0 + $0x224] sm:$0xf] }
  0x2f   :  { %534 = vmatpush.bf16.msra.mxu1 %v510_v19  ;;  %970 = vmatmul.msk.bf16.vlgmr.msrb.gmra.mxu2 %vm132_vm2, %v1460_v26  ;;  %v759_v19 = vld [vmem:[%s1831_s2] sm:$0x3f]  ;;  %v1151_v35 = vor.u32 %v1252_v28, %v1148_v30  ;;  %v1132_v41 = vld [vmem:[%s1829_s0 + $0x230] sm:$0xf0]  ;;  %v1138_v42 = vld [vmem:[%s1829_s0 + $0x228] sm:$0xf] }
  0x30   :  { %547 = vmatpush.bf16.msra.mxu2 %v513_v20  ;;  %971 = vmatmul.msk.bf16.vlgmr.msrb.gmra.mxu3 %vm132_vm2, %v1460_v26  ;;  %v1007_v20 = vor.u32 %v1221_v11, %v1004_v12  ;;  %v1249_v44 = vld [vmem:[%s1829_s0 + $0x22c] sm:$0xf]  ;;  %v1140_v45 = vld [vmem:[%s1829_s0 + $0x238] sm:$0xf0]  ;;  %v1114_v49 = vld [vmem:[%s1829_s0 + $0x200] sm:$0xf] }
  0x31   :  { %560 = vmatpush.bf16.msra.mxu3 %v516_v24  ;;  %1262 = vset.pattern.permute.xlu0 %v1264_v22  ;;  %v698_v24 = vand.u32 %v1171_v14, %v1291_v5  ;;  %v1156_v5 = vld [vmem:[%s1829_s0 + $0x258] sm:$0xf0]  ;;  %v1246_v50 = vld [vmem:[%s1829_s0 + $0x20c] sm:$0xf0]  ;;  %v1143_v52 = vor.u32 %v1249_v44, %v1140_v45  ;;  %v1116_v53 = vld [vmem:[%s1829_s0 + $0x210] sm:$0xf0] }
  0x32   :  { %522 = vmatpush.bf16.msra.mxu0 %v1043_v31  ;;  %762 = vperm.xlu0 %1262, %v759_v19   ;;  %v1154_v31 = vld [vmem:[%s1829_s0 + $0x248] sm:$0xf]  ;;  %v1247_v55 = vld [vmem:[%s1829_s0 + $0x214] sm:$0xf0]  ;;  %v1245_v56 = vld [vmem:[%s1829_s0 + $0x20c] sm:$0xf]  ;;  %v1115_v58 = vor.u32 %v1246_v50, %v1114_v49 }
  0x33   :  { %535 = vmatpush.bf16.msra.mxu1 %v1047_v32  ;;  %v1255_v32 = vld [vmem:[%s1829_s0 + $0x254] sm:$0xf0]  ;;  %v1122_v54 = vld [vmem:[%s1829_s0 + $0x208] sm:$0xf]  ;;  %v1124_v57 = vld [vmem:[%s1829_s0 + $0x218] sm:$0xf0] }
  0x34   :  { %548 = vmatpush.bf16.msra.mxu2 %v1051_v33  ;;  %v1253_v33 = vld [vmem:[%s1829_s0 + $0x24c] sm:$0xf]  ;;  %v1155_v36 = vor.u32 %v1255_v32, %v1154_v31  ;;  %v1098_v61 = vld [vmem:[%s1829_s0 + $0x1e0] sm:$0xf]  ;;  %v1242_v62 = vld [vmem:[%s1829_s0 + $0x1ec] sm:$0xf0] }
  0x35   :  { %561 = vmatpush.bf16.msra.mxu3 %v1055_v37  ;;  %v1130_v37 = vld [vmem:[%s1829_s0 + $0x220] sm:$0xf]  ;;  %v1159_v40 = vor.u32 %v1253_v33, %v1156_v5  ;;  %v1240_v63 = vld [vmem:[%s1829_s0 + $0x1e4] sm:$0xf]  ;;  %v1106_v2 = vld [vmem:[%s1829_s0 + $0x1e8] sm:$0xf]  ;;  %v1099_v7 = vor.u32 %v1242_v62, %v1098_v61 }
  0x36   :  { %523 = vmatpush.bf16.msra.mxu0 %v1027_v43  ;;  %v1251_v43 = vld [vmem:[%s1829_s0 + $0x234] sm:$0xf0]  ;;  %v1241_v4 = vld [vmem:[%s1829_s0 + $0x1ec] sm:$0xf] }
  0x37   :  { %536 = vmatpush.bf16.msra.mxu1 %v1031_v46  ;;  %v1131_v46 = vor.u32 %v1250_v38, %v1130_v37  ;;  %v1139_v48 = vor.u32 %v1251_v43, %v1138_v42  ;;  %v1243_v3 = vld [vmem:[%s1829_s0 + $0x1f4] sm:$0xf0] }
  0x38   :  { %549 = vmatpush.bf16.msra.mxu2 %v1035_v47  ;;  %v1135_v47 = vor.u32 %v1248_v39, %v1132_v41  ;;  %v1107_v9 = vor.u32 %v1243_v3, %v1106_v2 }
  0x39   :  { %562 = vmatpush.bf16.msra.mxu3 %v1039_v51  ;;  %v1244_v51 = vld [vmem:[%s1829_s0 + $0x204] sm:$0xf] }
  0x3a   :  { %524 = vmatpush.bf16.msra.mxu0 %v1011_v60  ;;  %v1119_v59 = vor.u32 %v1244_v51, %v1116_v53  ;;  %v1123_v60 = vor.u32 %v1247_v55, %v1122_v54 }
  0x3b   :  { %537 = vmatpush.bf16.msra.mxu1 %v1015_v0  ;;  %v1127_v0 = vor.u32 %v1245_v56, %v1124_v57 }
  0x3c   :  { %550 = vmatpush.bf16.msra.mxu2 %v1019_v1  ;;  %v1100_v1 = vld [vmem:[%s1829_s0 + $0x1f0] sm:$0xf0] }
  0x3d   :  { %563 = vmatpush.bf16.msra.mxu3 %v1023_v6  ;;  %v1108_v6 = vld [vmem:[%s1829_s0 + $0x1f8] sm:$0xf0]  ;;  %v1103_v8 = vor.u32 %v1240_v63, %v1100_v1 }
  0x3e   :  { %525 = vmatpush.bf16.msra.mxu0 %v995_v15  ;;  %v1111_v10 = vor.u32 %v1241_v4, %v1108_v6 }
  0x3f   :  { %538 = vmatpush.bf16.msra.mxu1 %v999_v17 }
  0x40   :  { %551 = vmatpush.bf16.msra.mxu2 %v1003_v18 }
  0x41   :  { %564 = vmatpush.bf16.msra.mxu3 %v1007_v20  ;;  %1072 = vmatmul.msk.bf16.vlgmr.msra.gmra.mxu0 %vm132_vm2, %v1460_v26 }
  0x42   :  { %706 = vmatpush.bf16.msrb.mxu0 %v692_v21  ;;  %1073 = vmatmul.msk.bf16.vlgmr.msra.gmra.mxu1 %vm132_vm2, %v1460_v26 }
  0x43   :  { %719 = vmatpush.bf16.msrb.mxu1 %v695_v23  ;;  %1074 = vmatmul.msk.bf16.vlgmr.msra.gmra.mxu2 %vm132_vm2, %v1460_v26 }
  0x44   :  { %732 = vmatpush.bf16.msrb.mxu2 %v698_v24  ;;  %1075 = vmatmul.msk.bf16.vlgmr.msra.gmra.mxu3 %vm132_vm2, %v1460_v26 }
  0x45   :  { %745 = vmatpush.bf16.msrb.mxu3 %v701_v29 }
  0x46   :  { %707 = vmatpush.bf16.msrb.mxu0 %v1147_v34 }
  0x47   :  { %720 = vmatpush.bf16.msrb.mxu1 %v1151_v35 }
  0x48   :  { %733 = vmatpush.bf16.msrb.mxu2 %v1155_v36 }
  0x49   :  { %746 = vmatpush.bf16.msrb.mxu3 %v1159_v40 }
  0x4a   :  { %708 = vmatpush.bf16.msrb.mxu0 %v1131_v46 }
  0x4b   :  { %721 = vmatpush.bf16.msrb.mxu1 %v1135_v47 }
  0x4c   :  { %734 = vmatpush.bf16.msrb.mxu2 %v1139_v48 }
  0x4d   :  { %747 = vmatpush.bf16.msrb.mxu3 %v1143_v52 }
  0x4e   :  { %709 = vmatpush.bf16.msrb.mxu0 %v1115_v58 }
  0x4f   :  { %722 = vmatpush.bf16.msrb.mxu1 %v1119_v59 }
  0x50   :  { %735 = vmatpush.bf16.msrb.mxu2 %v1123_v60 }
  0x51   :  { %748 = vmatpush.bf16.msrb.mxu3 %v1127_v0 }
  0x52   :  { %710 = vmatpush.bf16.msrb.mxu0 %v1099_v7 }
  0x53   :  { %723 = vmatpush.bf16.msrb.mxu1 %v1103_v8 }
  0x54   :  { %736 = vmatpush.bf16.msrb.mxu2 %v1107_v9 }
  0x55   :  { %749 = vmatpush.bf16.msrb.mxu3 %v1111_v10  ;;  %1176 = vmatmul.msk.bf16.vlgmr.msrb.gmra.mxu0 %vm132_vm2, %v1460_v26 }
  0x56   :  { %1177 = vmatmul.msk.bf16.vlgmr.msrb.gmra.mxu1 %vm132_vm2, %v1460_v26 }
  0x57   :  { %1178 = vmatmul.msk.bf16.vlgmr.msrb.gmra.mxu2 %vm132_vm2, %v1460_v26 }
  0x58   :  { %1179 = vmatmul.msk.bf16.vlgmr.msrb.gmra.mxu3 %vm132_vm2, %v1460_v26 }
  0x96   :  { %v161_v11 = vpop.f32.mrf.mxu0 }
  0x97   :  { %v174_v12 = vpop.f32.mrf.mxu1 }
  0x9e   :  { %v187_v13 = vpop.f32.mrf.mxu2  ;;  %v163_v15 = vpop.f32.mrf.mxu0 }
  0x9f   :  { %v200_v14 = vpop.f32.mrf.mxu3  ;;  %v176_v16 = vpop.f32.mrf.mxu1 }
  0xa4   :  { %v763_v39 = vpop.permute.xlu0 %762 }
  0xa6   :  { %v189_v17 = vpop.f32.mrf.mxu2 }
  0xa7   :  { %v202_v18 = vpop.f32.mrf.mxu3 }
  0xaa   :  { %v342_v19 = vpop.f32.mrf.mxu0 }
  0xab   :  { %v355_v20 = vpop.f32.mrf.mxu1  ;;  %v385_v33 = vmax.f32 %v161_v11, %v342_v19 }
  0xac   :  { %v386_v5 = vmax.f32 %v174_v12, %v355_v20 }
  0xb2   :  { %v368_v21 = vpop.f32.mrf.mxu2  ;;  %v344_v23 = vpop.f32.mrf.mxu0 }
  0xb3   :  { %v381_v22 = vpop.f32.mrf.mxu3  ;;  %v357_v24 = vpop.f32.mrf.mxu1  ;;  %v387_v44 = vmax.f32 %v187_v13, %v368_v21 }
  0xb4   :  { %v388_v46 = vmax.f32 %v200_v14, %v381_v22 }
  0xba   :  { %v370_v25 = vpop.f32.mrf.mxu2 }
  0xbb   :  { %v383_v27 = vpop.f32.mrf.mxu3 }
  0xbe   :  { %v527_v28 = vpop.f32.mrf.mxu0 }
  0xbf   :  { %v540_v29 = vpop.f32.mrf.mxu1  ;;  %v570_v35 = vmax.f32 %v385_v33, %v527_v28 }
  0xc0   :  { %v571_v37 = vmax.f32 %v386_v5, %v540_v29 }
  0xc6   :  { %v553_v30 = vpop.f32.mrf.mxu2  ;;  %v529_v31 = vpop.f32.mrf.mxu0 }
  0xc7   :  { %v566_v26 = vpop.f32.mrf.mxu3  ;;  %v542_v32 = vpop.f32.mrf.mxu1  ;;  %v572_v48 = vmax.f32 %v387_v44, %v553_v30 }
  0xc8   :  { %v573_v50 = vmax.f32 %v388_v46, %v566_v26 }
  0xce   :  { %v555_v34 = vpop.f32.mrf.mxu2 }
  0xcf   :  { %v568_v36 = vpop.f32.mrf.mxu3 }
  0xd2   :  { %v712_v38 = vpop.f32.mrf.mxu0 }
  0xd3   :  { %v755_v40 = vmax.f32 %v570_v35, %v712_v38  ;;  %v725_v41 = vpop.f32.mrf.mxu1 }
  0xd4   :  { %v756_v42 = vmax.f32 %v571_v37, %v725_v41 }
  0xd5   :  { %v765_v43 = vadd.f32 %v763_v39, %v755_v40 }
  0xd6   :  { %v766_v45 = vadd.f32 %v763_v39, %v756_v42 }
  0xd7   :  { %v769_v47 = vmax.f32 %v765_v43, 0.0 }
  0xd8   :  { %v770_v49 = vmax.f32 %v766_v45, 0.0 }
  0xda   :  { %v738_v51 = vpop.f32.mrf.mxu2  ;;  %v773_v52 = vpack.c.bf16 %v770_v49, %v769_v47  ;;  %v714_v55 = vpop.f32.mrf.mxu0 }
  0xdb   :  { %v757_v53 = vmax.f32 %v572_v48, %v738_v51  ;;  %v751_v54 = vpop.f32.mrf.mxu3  ;;  %v727_v57 = vpop.f32.mrf.mxu1 }
  0xdc   :  { %v758_v56 = vmax.f32 %v573_v50, %v751_v54  ;;  %775 = vst [vmem:[%s1832_s3] sm:$0x77] %v773_v52 }
  0xdd   :  { %v767_v58 = vadd.f32 %v763_v39, %v757_v53 }
  0xde   :  { %v768_v59 = vadd.f32 %v763_v39, %v758_v56 }
  0xdf   :  { %v771_v60 = vmax.f32 %v767_v58, 0.0 }
  0xe0   :  { %v772_v61 = vmax.f32 %v768_v59, 0.0 }
  0xe2   :  { %v774_v62 = vpack.c.bf16 %v772_v61, %v771_v60  ;;  %v740_v63 = vpop.f32.mrf.mxu2 }
  0xe3   :  { %v753_v0 = vpop.f32.mrf.mxu3 }
  0xe4   :  { %779 = vst.msk [vmem:[%s1832_s3 + $0x8] sm:$0x77] %vm778_vm5, %v774_v62 }

// kernel: net_forward.4
= control target key start
LH: loop header
LB: loop body
LE: loop exit
PB: predicated region body
PF: predicated region fallthrough
CT: control target
= control target key end

     0   :  { %vm106_vm0 = vcmask 1042432   ;;  %vm102_vm1 = vcmask 179200   ;;  %v746_v35 = vmov 0   ;;  %vm486_vm2 = vcmask 404480   ;;  %s925_s0 = inlined_call_operand.vmem [shape: bf16[4,150,50], index: 0, kind: input, shape index: {}]   ;;  %s926_s1 = inlined_call_operand.vmem [shape: bf16[16,150], index: 1, kind: input, shape index: {}]   ;;  %s927_s2 = inlined_call_operand.vmem [shape: f32[16,1], index: 2, kind: input, shape index: {}]   ;;  %s928_s3 = inlined_call_operand.vmem [shape: bf16[16,50], index: 3, kind: output, shape index: {}]  }
   0x1   :  { %v715_v0 = vld [vmem:[%s925_s0 + $0x38] sm:$0xff]  ;;  %v724_v1 = vld [vmem:[%s925_s0 + $0x84] sm:$0xff]  ;;  %v714_v4 = vld [vmem:[%s925_s0 + $0x30] sm:$0xff]  ;;  %745 = vset.pattern.permute.xlu0 %v746_v35 }
   0x2   :  { %v35_v2 = vld [vmem:[%s925_s0 + $0x48] sm:$0x7]  ;;  %110 = vmatpush.bf16.msra.mxu0 %v715_v0  ;;  %218 = vmatpush.bf16.msra.mxu2 %v724_v1  ;;  %v612_v5 = vld [vmem:[%s925_s0 + $0xe0] sm:$0x7]  ;;  %v722_v14 = vld [vmem:[%s925_s0 + $0x74] sm:$0xff] }
   0x3   :  { %v82_v3 = vunpack.c.l.b16 %v35_v2  ;;  %v723_v7 = vld [vmem:[%s925_s0 + $0x7c] sm:$0xff]  ;;  %v305_v8 = vunpack.c.l.b16 %v612_v5  ;;  %v713_v12 = vld [vmem:[%s925_s0 + $0x28] sm:$0xff]  ;;  %v733_v15 = vld [vmem:[%s925_s0 + $0xd0] sm:$0xff] }
   0x4   :  { %v716_v11 = vld [vmem:[%s925_s0 + $0x40] sm:$0xff]  ;;  %v734_v17 = vld [vmem:[%s925_s0 + $0xd8] sm:$0xff]  ;;  %v497_v18 = vld [vmem:[%s926_s1 + $0x8] sm:$0xf0] }
   0x5   :  { %v92_v6 = vpack.c.b16 %v82_v3, %v82_v3  ;;  %v315_v10 = vpack.c.b16 %v305_v8, %v305_v8  ;;  %v706_v16 = vld [vmem:[%s926_s1 + $0x4] sm:$0xf]  ;;  %v742_v19 = vld [vmem:[%s925_s0 + $0x11c] sm:$0xff]  ;;  %v721_v22 = vld [vmem:[%s925_s0 + $0x6c] sm:$0xff] }
   0x6   :  { %111 = vmatpush.bf16.msra.mxu0 %v714_v4  ;;  %219 = vmatpush.bf16.msra.mxu2 %v723_v7  ;;  %v811_v20 = vor.u32 %v706_v16, %v497_v18  ;;  %v712_v21 = vld [vmem:[%s925_s0 + $0x20] sm:$0xff]  ;;  %v732_v23 = vld [vmem:[%s925_s0 + $0xc8] sm:$0xff]  ;;  %v741_v24 = vld [vmem:[%s925_s0 + $0x114] sm:$0xff] }
   0x7   :  { %v108_v9 = vsel %vm106_vm0, %v92_v6, 0  ;;  %v326_v13 = vsel %vm106_vm0, %v315_v10, 0  ;;  %v711_v25 = vld [vmem:[%s925_s0 + $0x18] sm:$0xff]  ;;  %v720_v26 = vld [vmem:[%s925_s0 + $0x64] sm:$0xff]  ;;  %v710_v28 = vld [vmem:[%s925_s0 + $0x10] sm:$0xff] }
   0x8   :  { %130 = vmatpush.bf16.msra.mxu1 %v108_v9  ;;  %348 = vmatpush.bf16.msra.mxu3 %v326_v13  ;;  %v731_v27 = vld [vmem:[%s925_s0 + $0xc0] sm:$0xff]  ;;  %v740_v29 = vld [vmem:[%s925_s0 + $0x10c] sm:$0xff]  ;;  %v556_v30 = vld [vmem:[%s925_s0 + $0x94] sm:$0x7] }
   0x9   :  { %v668_v31 = vld [vmem:[%s925_s0 + $0x12c] sm:$0x7]  ;;  %v468_v32 = vld [vmem:[%s927_s2] sm:$0xff]  ;;  %v730_v34 = vld [vmem:[%s925_s0 + $0xb8] sm:$0xff]  ;;  %v195_v37 = vunpack.c.l.b16 %v556_v30 }
   0xa   :  { %112 = vmatpush.bf16.msra.mxu0 %v713_v12  ;;  %220 = vmatpush.bf16.msra.mxu2 %v722_v14  ;;  %v719_v33 = vld [vmem:[%s925_s0 + $0x5c] sm:$0xff]  ;;  %v739_v36 = vld [vmem:[%s925_s0 + $0x104] sm:$0xff]  ;;  %v415_v38 = vunpack.c.l.b16 %v668_v31  ;;  %v718_v40 = vld [vmem:[%s925_s0 + $0x54] sm:$0xff] }
   0xb   :  { %472 = vperm.xlu0 %745, %v468_v32   ;;  %v709_v39 = vld [vmem:[%s925_s0 + $0x8] sm:$0xff]  ;;  %v729_v41 = vld [vmem:[%s925_s0 + $0xb0] sm:$0xff]  ;;  %v708_v42 = vld [vmem:[%s925_s0] sm:$0xff]  ;;  %v205_v44 = vpack.c.b16 %v195_v37, %v195_v37 }
   0xc   :  { %131 = vmatpush.bf16.msra.mxu1 %v716_v11  ;;  %349 = vmatpush.bf16.msra.mxu3 %v734_v17  ;;  %v738_v43 = vld [vmem:[%s925_s0 + $0xfc] sm:$0xff]  ;;  %v425_v45 = vpack.c.b16 %v415_v38, %v415_v38  ;;  %v707_v47 = vld [vmem:[%s926_s1 + $0x4] sm:$0xf0]  ;;  %v717_v49 = vld [vmem:[%s925_s0 + $0x4c] sm:$0xff] }
   0xd   :  { %v495_v46 = vld [vmem:[%s926_s1] sm:$0xf]  ;;  %v469_v48 = vld [vmem:[%s927_s2 + $0x8] sm:$0xff]  ;;  %v216_v52 = vsel %vm106_vm0, %v205_v44, 0  ;;  %v737_v53 = vld [vmem:[%s925_s0 + $0xf4] sm:$0xff] }
   0xe   :  { %113 = vmatpush.bf16.msra.mxu0 %v712_v21  ;;  %221 = vmatpush.bf16.msra.mxu2 %v721_v22  ;;  %v728_v50 = vld [vmem:[%s925_s0 + $0xa8] sm:$0xff]  ;;  %v496_v51 = vor.u32 %v707_v47, %v495_v46  ;;  %v436_v54 = vsel %vm106_vm0, %v425_v45, 0  ;;  %v727_v55 = vld [vmem:[%s925_s0 + $0xa0] sm:$0xff]  ;;  %v726_v59 = vld [vmem:[%s925_s0 + $0x98] sm:$0xff] }
   0xf   :  { %537 = vmatmul.msk.bf16.vlgmr.msra.gmra.mxu1 %vm102_vm1, %v811_v20  ;;  %649 = vmatmul.msk.bf16.vlgmr.msra.gmra.mxu3 %vm102_vm1, %v811_v20  ;;  %v725_v56 = vld [vmem:[%s925_s0 + $0x8c] sm:$0xff]  ;;  %v743_v57 = vld [vmem:[%s925_s0 + $0x124] sm:$0xff] }
  0x10   :  { %328 = vmatpush.bf16.msrb.mxu1 %v733_v15  ;;  %438 = vmatpush.bf16.msrb.mxu3 %v742_v19  ;;  %v736_v58 = vld [vmem:[%s925_s0 + $0xec] sm:$0xff]  ;;  %v735_v60 = vld [vmem:[%s925_s0 + $0xe4] sm:$0xff] }
  0x12   :  { %114 = vmatpush.bf16.msra.mxu0 %v711_v25  ;;  %222 = vmatpush.bf16.msra.mxu2 %v720_v26 }
  0x13   :  { %477 = vperm.xlu0 %745, %v469_v48  }
  0x14   :  { %329 = vmatpush.bf16.msrb.mxu1 %v732_v23  ;;  %439 = vmatpush.bf16.msrb.mxu3 %v741_v24 }
  0x16   :  { %115 = vmatpush.bf16.msra.mxu0 %v710_v28  ;;  %223 = vmatpush.bf16.msra.mxu2 %v719_v33 }
  0x18   :  { %330 = vmatpush.bf16.msrb.mxu1 %v731_v27  ;;  %440 = vmatpush.bf16.msrb.mxu3 %v740_v29 }
  0x1a   :  { %116 = vmatpush.bf16.msra.mxu0 %v709_v39  ;;  %224 = vmatpush.bf16.msra.mxu2 %v718_v40 }
  0x1c   :  { %331 = vmatpush.bf16.msrb.mxu1 %v730_v34  ;;  %441 = vmatpush.bf16.msrb.mxu3 %v739_v36 }
  0x1e   :  { %117 = vmatpush.bf16.msra.mxu0 %v708_v42  ;;  %225 = vmatpush.bf16.msra.mxu2 %v717_v49 }
  0x20   :  { %332 = vmatpush.bf16.msrb.mxu1 %v729_v41  ;;  %442 = vmatpush.bf16.msrb.mxu3 %v738_v43 }
  0x21   :  { %118 = vmatmul.bf16.vlgmr.msra.gmra.mxu0 %v496_v51  ;;  %226 = vmatmul.bf16.vlgmr.msra.gmra.mxu2 %v496_v51 }
  0x22   :  { %238 = vmatpush.bf16.msrb.mxu2 %v216_v52  ;;  %458 = vmatpush.bf16.msrb.mxu0 %v436_v54 }
  0x24   :  { %333 = vmatpush.bf16.msrb.mxu1 %v728_v50  ;;  %443 = vmatpush.bf16.msrb.mxu3 %v737_v53 }
  0x26   :  { %239 = vmatpush.bf16.msrb.mxu2 %v725_v56  ;;  %459 = vmatpush.bf16.msrb.mxu0 %v743_v57 }
  0x28   :  { %334 = vmatpush.bf16.msrb.mxu1 %v727_v55  ;;  %444 = vmatpush.bf16.msrb.mxu3 %v736_v58 }
  0x2c   :  { %335 = vmatpush.bf16.msrb.mxu1 %v726_v59  ;;  %445 = vmatpush.bf16.msrb.mxu3 %v735_v60 }
  0x2f   :  { %336 = vmatmul.bf16.vlgmr.msrb.gmra.mxu1 %v496_v51  ;;  %446 = vmatmul.bf16.vlgmr.msrb.gmra.mxu3 %v496_v51 }
  0x31   :  { %705 = vmatmul.msk.bf16.vlgmr.msrb.gmra.mxu0 %vm102_vm1, %v811_v20  ;;  %593 = vmatmul.msk.bf16.vlgmr.msrb.gmra.mxu2 %vm102_vm1, %v811_v20 }
  0x7d   :  { %v473_v15 = vpop.permute.xlu0 %472 }
  0x85   :  { %v478_v31 = vpop.permute.xlu0 %477 }
  0x8c   :  { %v133_v61 = vpop.f32.mrf.mxu1 }
  0x92   :  { %v351_v62 = vpop.f32.mrf.mxu3 }
  0x94   :  { %v135_v1 = vpop.f32.mrf.mxu1 }
  0x9a   :  { %v353_v2 = vpop.f32.mrf.mxu3 }
  0x9e   :  { %v119_v63 = vpop.f32.mrf.mxu0 }
  0x9f   :  { %v134_v9 = vadd.f32 %v133_v61, %v119_v63 }
  0xa4   :  { %v227_v0 = vpop.f32.mrf.mxu2 }
  0xa6   :  { %v121_v3 = vpop.f32.mrf.mxu0 }
  0xa7   :  { %v136_v19 = vadd.f32 %v135_v1, %v121_v3 }
  0xac   :  { %v229_v4 = vpop.f32.mrf.mxu2  ;;  %v337_v5 = vpop.f32.mrf.mxu1 }
  0xad   :  { %v352_v11 = vadd.f32 %v351_v62, %v337_v5 }
  0xae   :  { %v461_v6 = vpop.f32.mrf.mxu0 }
  0xb2   :  { %v447_v7 = vpop.f32.mrf.mxu3 }
  0xb3   :  { %v462_v12 = vadd.f32 %v461_v6, %v447_v7 }
  0xb4   :  { %v241_v8 = vpop.f32.mrf.mxu2  ;;  %v339_v17 = vpop.f32.mrf.mxu1 }
  0xb5   :  { %v242_v10 = vadd.f32 %v241_v8, %v227_v0  ;;  %v354_v24 = vadd.f32 %v353_v2, %v339_v17 }
  0xb6   :  { %v463_v23 = vpop.f32.mrf.mxu0 }
  0xb7   :  { %v246_v13 = vmax.f32 %v134_v9, %v242_v10 }
  0xb9   :  { %v356_v14 = vmax.f32 %v246_v13, %v352_v11 }
  0xba   :  { %v449_v22 = vpop.f32.mrf.mxu3 }
  0xbb   :  { %v466_v16 = vmax.f32 %v356_v14, %v462_v12  ;;  %v464_v28 = vadd.f32 %v463_v23, %v449_v22 }
  0xbc   :  { %v243_v18 = vpop.f32.mrf.mxu2 }
  0xbd   :  { %v480_v20 = vadd.f32 %v473_v15, %v466_v16  ;;  %v244_v21 = vadd.f32 %v243_v18, %v229_v4 }
  0xbf   :  { %v482_v25 = vmax.f32 %v480_v20, 0.0  ;;  %v247_v26 = vmax.f32 %v136_v19, %v244_v21 }
  0xc1   :  { %v484_v27 = vpack.c.bf16 %v482_v25, %v482_v25  ;;  %v357_v29 = vmax.f32 %v247_v26, %v354_v24 }
  0xc3   :  { %487 = vst.msk [vmem:[%s928_s3] sm:$0xf] %vm486_vm2, %v484_v27  ;;  %v467_v30 = vmax.f32 %v357_v29, %v464_v28 }
  0xc5   :  { %v481_v32 = vadd.f32 %v478_v31, %v467_v30 }
  0xc7   :  { %v483_v33 = vmax.f32 %v481_v32, 0.0 }
  0xc9   :  { %v485_v34 = vpack.c.bf16 %v483_v33, %v483_v33 }
  0xcb   :  { %488 = vst.msk [vmem:[%s928_s3 + $0x4] sm:$0xf] %vm486_vm2, %v485_v34 }

// kernel: net_forward.5
= control target key start
LH: loop header
LB: loop body
LE: loop exit
PB: predicated region body
PF: predicated region fallthrough
CT: control target
= control target key end

     0   :  { %vm367_vm0 = vcmask 1043456   ;;  %s864_s0 = inlined_call_operand.vmem [shape: bf16[2,400], index: 0, kind: input, shape index: {}]   ;;  %s865_s1 = inlined_call_operand.vmem [shape: bf16[400,120], index: 1, kind: input, shape index: {}]   ;;  %s866_s2 = inlined_call_operand.vmem [shape: f32[1,120], index: 2, kind: input, shape index: {}]   ;;  %s867_s3 = inlined_call_operand.vmem [shape: bf16[120,84], index: 3, kind: input, shape index: {}]   ;;  %s868_s4 = inlined_call_operand.vmem [shape: f32[1,84], index: 4, kind: input, shape index: {}]   ;;  %s869_s5 = inlined_call_operand.vmem [shape: bf16[84,10], index: 5, kind: input, shape index: {}]   ;;  %s870_s6 = inlined_call_operand.vmem [shape: f32[1,10], index: 6, kind: input, shape index: {}]   ;;  %s871_s7 = inlined_call_operand.hbm [shape: f32[2,10], index: 7, kind: output, shape index: {}]  }
   0x1   :  { %v631_v0 = vld [vmem:[%s865_s1 + $0x38] sm:$0xff]  ;;  %v630_v3 = vld [vmem:[%s865_s1 + $0x30] sm:$0xff]  ;;  %v629_v6 = vld [vmem:[%s865_s1 + $0x28] sm:$0xff] }
   0x2   :  { %v639_v1 = vld [vmem:[%s865_s1 + $0x78] sm:$0xff]  ;;  %245 = vmatpush.bf16.msra.mxu0 %v631_v0  ;;  %v638_v4 = vld [vmem:[%s865_s1 + $0x70] sm:$0xff]  ;;  %v637_v7 = vld [vmem:[%s865_s1 + $0x68] sm:$0xff] }
   0x3   :  { %v647_v2 = vld [vmem:[%s865_s1 + $0xb8] sm:$0xff]  ;;  %258 = vmatpush.bf16.msra.mxu1 %v639_v1  ;;  %v646_v5 = vld [vmem:[%s865_s1 + $0xb0] sm:$0xff]  ;;  %v648_v8 = vld [vmem:[%s865_s1 + $0xc0] sm:$0xff] }
   0x4   :  { %271 = vmatpush.bf16.msra.mxu2 %v647_v2  ;;  %v645_v9 = vld [vmem:[%s865_s1 + $0xa8] sm:$0xff]  ;;  %v28_v10 = vld [vmem:[%s864_s0] sm:$0xf]  ;;  %291 = vmatpush.bf16.msra.mxu3 %v648_v8  ;;  %v313_v11 = vld [vmem:[%s867_s3 + $0x38] sm:$0xf] }
   0x5   :  { %84 = vst [vmem:[#allocation1] ss:$9 sm:$0xff] %v28_v10  ;;  %v628_v12 = vld [vmem:[%s865_s1 + $0x20] sm:$0xff]  ;;  %v347_v13 = vunpack.c.l.b16 %v313_v11 }
   0x6   :  { %246 = vmatpush.bf16.msra.mxu0 %v630_v3  ;;  %v636_v14 = vld [vmem:[%s865_s1 + $0x60] sm:$0xff] }
   0x7   :  { %259 = vmatpush.bf16.msra.mxu1 %v638_v4  ;;  %v644_v15 = vld [vmem:[%s865_s1 + $0xa0] sm:$0xff]  ;;  %v355_v16 = vpack.c.b16 %v347_v13, %v347_v13 }
   0x8   :  { %272 = vmatpush.bf16.msra.mxu2 %v646_v5 }
   0xa   :  { %247 = vmatpush.bf16.msra.mxu0 %v629_v6 }
   0xb   :  { %260 = vmatpush.bf16.msra.mxu1 %v637_v7 }
   0xc   :  { %273 = vmatpush.bf16.msra.mxu2 %v645_v9 }
   0xd   :  { %12 = vsyncpa [#allocation3], 0  ;;  %vm242_vm1 = vcmask 130048   ;;  %v369_v17 = vsel %vm367_vm0, %v355_v16, 0  ;;  %v627_v18 = vld [vmem:[%s865_s1 + $0x18] sm:$0xff]  ;;  %v655_v22 = vld [vmem:[%s867_s3 + $0x30] sm:$0xff] }
   0xe   :  { %248 = vmatpush.bf16.msra.mxu0 %v628_v12  ;;  %v635_v19 = vld [vmem:[%s865_s1 + $0x58] sm:$0xff]  ;;  %371 = vmatpush.bf16.msrb.mxu3 %v369_v17  ;;  %v626_v23 = vld [vmem:[%s865_s1 + $0x10] sm:$0xff]  ;;  %v654_v26 = vld [vmem:[%s867_s3 + $0x28] sm:$0xff]  ;;  %vm438_vm2 = vcmask 1041408   ;;  %vm363_vm3 = vcmask 982016   ;;  %vm434_vm4 = vcmask 687104  }
   0xf   :  { %261 = vmatpush.bf16.msra.mxu1 %v636_v14  ;;  %v643_v20 = vld [vmem:[%s865_s1 + $0x98] sm:$0xff]  ;;  %v634_v24 = vld [vmem:[%s865_s1 + $0x50] sm:$0xff]  ;;  %v625_v27 = vld [vmem:[%s865_s1 + $0x8] sm:$0xff]  ;;  %s691_s12 = smov [#allocation2]   ;;  %s464_s15 = sshll.u32 %s871_s7, 4  ;;  %vm455_vm5 = vcmask 74752   ;;  %s465_s15 = int_to_ptr.hbm [resolvable:$true] %s464_s15 }
  0x10   :  { %274 = vmatpush.bf16.msra.mxu2 %v644_v15  ;;  %v88_v21 = vld [vmem:[#allocation1 + $0x1b] sm:$0xff]  ;;  %v642_v25 = vld [vmem:[%s865_s1 + $0x90] sm:$0xff]  ;;  %v633_v28 = vld [vmem:[%s865_s1 + $0x48] sm:$0xff]  ;;  %s462_s13 = sshll.u32 %s691_s12, 4  ;;  %s463_s13 = int_to_ptr.vmem [resolvable:$true] %s462_s13 }
  0x11   :  { %573 = vmatmul.msk.bf16.vlgmr.msra.gmra.mxu3 %vm242_vm1, %v88_v21  ;;  %v641_v29 = vld [vmem:[%s865_s1 + $0x88] sm:$0xff]  ;;  %v653_v30 = vld [vmem:[%s867_s3 + $0x20] sm:$0xff]  ;;  %v87_v36 = vld [vmem:[#allocation1 + $0x12] sm:$0xff] }
  0x12   :  { %249 = vmatpush.bf16.msra.mxu0 %v627_v18  ;;  %372 = vmatpush.bf16.msrb.mxu3 %v655_v22  ;;  %v624_v31 = vld [vmem:[%s865_s1] sm:$0xff]  ;;  %v86_v35 = vld [vmem:[#allocation1 + $0x9] sm:$0xff]  ;;  %v652_v37 = vld [vmem:[%s867_s3 + $0x18] sm:$0xff] }
  0x13   :  { %262 = vmatpush.bf16.msra.mxu1 %v635_v19  ;;  %v632_v32 = vld [vmem:[%s865_s1 + $0x40] sm:$0xff]  ;;  %v651_v38 = vld [vmem:[%s867_s3 + $0x10] sm:$0xff]  ;;  %v650_v39 = vld [vmem:[%s867_s3 + $0x8] sm:$0xff] }
  0x14   :  { %275 = vmatpush.bf16.msra.mxu2 %v643_v20  ;;  %v640_v33 = vld [vmem:[%s865_s1 + $0x80] sm:$0xff]  ;;  %v396_v41 = vld [vmem:[%s869_s5 + $0x28] sm:$0x3]  ;;  %v659_v47 = vld [vmem:[%s869_s5 + $0x18] sm:$0xff] }
  0x15   :  { %v85_v34 = vld [vmem:[#allocation1] sm:$0xff]  ;;  %v422_v42 = vunpack.c.l.b16 %v396_v41  ;;  %v658_v50 = vld [vmem:[%s869_s5 + $0x10] sm:$0xff]  ;;  %v657_v63 = vld [vmem:[%s869_s5 + $0x8] sm:$0xff] }
  0x16   :  { %250 = vmatpush.bf16.msra.mxu0 %v626_v23  ;;  %373 = vmatpush.bf16.msrb.mxu3 %v654_v26  ;;  %v649_v40 = vld [vmem:[%s867_s3] sm:$0xff] }
  0x17   :  { %263 = vmatpush.bf16.msra.mxu1 %v634_v24  ;;  %v428_v43 = vpack.c.b16 %v422_v42, %v422_v42  ;;  %v660_v46 = vld [vmem:[%s869_s5 + $0x20] sm:$0xff] }
  0x18   :  { %276 = vmatpush.bf16.msra.mxu2 %v642_v25  ;;  %v662_v48 = vld [vmem:[%s866_s2] ss:$0 sm:$0xff] }
  0x19   :  { %v440_v45 = vsel %vm438_vm2, %v428_v43, 0  ;;  %v656_v0 = vld [vmem:[%s869_s5] sm:$0xff] }
  0x1a   :  { %251 = vmatpush.bf16.msra.mxu0 %v625_v27  ;;  %374 = vmatpush.bf16.msrb.mxu3 %v653_v30  ;;  %v663_v1 = vld [vmem:[%s868_s4] ss:$0 sm:$0xff] }
  0x1b   :  { %264 = vmatpush.bf16.msra.mxu1 %v633_v28  ;;  %v664_v7 = vld [vmem:[%s870_s6] ss:$0 sm:$0xff] }
  0x1c   :  { %277 = vmatpush.bf16.msra.mxu2 %v641_v29 }
  0x1e   :  { %252 = vmatpush.bf16.msra.mxu0 %v624_v31  ;;  %375 = vmatpush.bf16.msrb.mxu3 %v652_v37 }
  0x1f   :  { %265 = vmatpush.bf16.msra.mxu1 %v632_v32 }
  0x20   :  { %278 = vmatpush.bf16.msra.mxu2 %v640_v33 }
  0x21   :  { %253 = vmatmul.bf16.vlgmr.msra.gmra.mxu0 %v85_v34 }
  0x22   :  { %266 = vmatmul.bf16.vlgmr.msra.gmra.mxu1 %v86_v35  ;;  %376 = vmatpush.bf16.msrb.mxu3 %v651_v38 }
  0x23   :  { %279 = vmatmul.bf16.vlgmr.msra.gmra.mxu2 %v87_v36  ;;  %444 = vmatpush.bf16.msrb.mxu0 %v440_v45 }
  0x26   :  { %377 = vmatpush.bf16.msrb.mxu3 %v650_v39 }
  0x27   :  { %445 = vmatpush.bf16.msrb.mxu0 %v660_v46 }
  0x2a   :  { %378 = vmatpush.bf16.msrb.mxu3 %v649_v40 }
  0x2b   :  { %446 = vmatpush.bf16.msrb.mxu0 %v659_v47 }
  0x2f   :  { %447 = vmatpush.bf16.msrb.mxu0 %v658_v50 }
  0x33   :  { %448 = vmatpush.bf16.msrb.mxu0 %v657_v63 }
  0x37   :  { %449 = vmatpush.bf16.msrb.mxu0 %v656_v0 }
  0x94   :  { %v293_v44 = vpop.f32.mrf.mxu3 }
  0x9c   :  { %v295_v49 = vpop.f32.mrf.mxu3 }
  0x9e   :  { %v254_v51 = vpop.f32.mrf.mxu0 }
  0x9f   :  { %v267_v52 = vpop.f32.mrf.mxu1  ;;  %v255_v53 = vadd.f32 %v662_v48, %v254_v51 }
  0xa1   :  { %v268_v54 = vadd.f32 %v267_v52, %v255_v53 }
  0xa6   :  { %v280_v55 = vpop.f32.mrf.mxu2  ;;  %v256_v57 = vpop.f32.mrf.mxu0 }
  0xa7   :  { %v281_v56 = vadd.f32 %v280_v55, %v268_v54  ;;  %v269_v58 = vpop.f32.mrf.mxu1 }
  0xa9   :  { %v294_v59 = vadd.f32 %v293_v44, %v281_v56 }
  0xab   :  { %v297_v60 = vmax.f32 %v294_v59, 0.0 }
  0xad   :  { %v298_v61 = vpack.c.bf16 %v297_v60, %v297_v60 }
  0xae   :  { %v282_v62 = vpop.f32.mrf.mxu2 }
  0xaf   :  { %602 = vmatmul.msk.bf16.vlgmr.msrb.gmra.mxu3 %vm363_vm3, %v298_v61 }
 0x132   :  { %v380_v2 = vpop.f32.mrf.mxu3 }
 0x133   :  { %v381_v3 = vadd.f32 %v663_v1, %v380_v2 }
 0x135   :  { %v384_v4 = vmax.f32 %v381_v3, 0.0 }
 0x137   :  { %v385_v5 = vpack.c.bf16 %v384_v4, %v384_v4 }
 0x139   :  { %623 = vmatmul.msk.bf16.vlgmr.msrb.gmra.mxu0 %vm434_vm4, %v385_v5 }
 0x13a   :  { %v382_v6 = vpop.f32.mrf.mxu3 }
 0x1b6   :  { %v451_v8 = vpop.f32.mrf.mxu0 }
 0x1b7   :  { %v452_v9 = vadd.f32 %v664_v7, %v451_v8 }
 0x1b9   :  { %456 = vst.msk [vmem:[#allocation2] sm:$0x3] %vm455_vm5, %v452_v9 }
 0x1ba   :  { %467 = dma.vmem_to_hbm [thread:$0]  %s463_s13, 32, %s465_s15, [#allocation3]  }
 0x1be   :  { %v453_v10 = vpop.f32.mrf.mxu0 }
 0x1bf   :  { %689 = dma.done.wait [#allocation3], 32  }
 0x1c0   :  { %690 = vsyncadd [#allocation3], 4294967264 }
 0x1c1   :  { %472 = vsyncpa [#allocation3], 1 }

</bundles_post_ra>
